<compile_context>
chip_gen: v7x
topology: tpu7x:2x2x1
jax: 0.10.0
libtpu: 0.0.40
codegen_flags: <defaults>
</compile_context>

<pallas_src>
import functools

import jax
import jax.numpy as jnp
from jax.experimental import pallas as pl
from jax.experimental.pallas import tpu as pltpu


# ----------------------------------------------------------------------------
# Helpers
# ----------------------------------------------------------------------------
def _round_up(value, multiple):
    return ((value + multiple - 1) // multiple) * multiple


# ----------------------------------------------------------------------------
# Fused kernel: all LSTM layers + final Linear, chunked over time.
# ----------------------------------------------------------------------------
def _make_fused_kernel(num_layers, hidden_dim, time_chunk, b_pad, seq_len,
                       masked_tail, unroll):
    H = hidden_dim

    def kernel(x_ref, *args):
        # args = [wih_0, whh_0, b_0, ..., wih_{L-1}, whh_{L-1}, b_{L-1}, w_out, b_out,
        #         out_ref, h_0, c_0, ..., h_{L-1}, c_{L-1}, zx_scratch, hseq_scratch]
        n_w = 3 * num_layers + 2
        w_refs = args[:n_w]
        out_ref = args[n_w]
        scratch = args[n_w + 1:]
        state = scratch[:2 * num_layers]            # (b_pad, H) f32, persist across chunks
        zx_ref = scratch[2 * num_layers]            # (Tc*b_pad, 4H) chunk-wide projection
        hseq_ref = scratch[2 * num_layers + 1]      # (Tc*b_pad, H) layer output sequence

        k = pl.program_id(0)

        @pl.when(k == 0)
        def _init():
            for r in state:
                r[...] = jnp.zeros_like(r)

        for layer in range(num_layers):
            wih = w_refs[3 * layer][...]            # (D_in, 4H), i/f/o cols pre-scaled by 0.5
            whh = w_refs[3 * layer + 1][...]        # (H,    4H), i/f/o cols pre-scaled by 0.5
            bias = w_refs[3 * layer + 2][...]       # (1,    4H), f32, pre-scaled likewise

            # Chunk-wide input projection: ONE large MXU matmul over all Tc timesteps
            # (time-parallel half of the LSTM).  Bias folded in here -> added once per chunk.
            seq_in = x_ref[...] if layer == 0 else hseq_ref[...]
            zx_ref[...] = jnp.dot(seq_in.astype(wih.dtype), wih,
                                  preferred_element_type=jnp.float32) + bias

            h_ref = state[2 * layer]
            c_ref = state[2 * layer + 1]
            write_seq = layer < num_layers - 1      # last layer's sequence is never re-read

            def step(t, carry, whh=whh, write_seq=write_seq):
                h_prev, c_prev = carry
                row = pl.multiple_of(t * b_pad, b_pad)   # sublane-aligned row block
                # Only the recurrent half stays on the serialized per-timestep path.
                z = zx_ref[pl.ds(row, b_pad), :] + jnp.dot(
                    h_prev.astype(whh.dtype), whh,
                    preferred_element_type=jnp.float32)
                # Single full-width transcendental pass (PyTorch gate order [i, f, g, o]):
                # i/f/o columns were pre-scaled by 0.5, so sigmoid(z) == 0.5*(tanh(z/2)+1).
                tz = jnp.tanh(z)
                i_g = 0.5 * tz[:, 0 * H:1 * H] + 0.5
                f_g = 0.5 * tz[:, 1 * H:2 * H] + 0.5
                g_g = tz[:, 2 * H:3 * H]
                o_g = 0.5 * tz[:, 3 * H:4 * H] + 0.5
                c_new = f_g * c_prev + i_g * g_g
                h_new = o_g * jnp.tanh(c_new)
                if masked_tail:
                    # Padded tail timesteps of the last chunk must not touch the state.
                    valid = (k * time_chunk + t) < seq_len
                    h_new = jnp.where(valid, h_new, h_prev)
                    c_new = jnp.where(valid, c_new, c_prev)
                if write_seq:
                    hseq_ref[pl.ds(row, b_pad), :] = h_new
                return h_new, c_new

            h_f, c_f = jax.lax.fori_loop(
                0, time_chunk, step, (h_ref[...], c_ref[...]),
                unroll=min(unroll, time_chunk))
            h_ref[...] = h_f
            c_ref[...] = c_f

        # Fused final Linear on the last (valid) timestep's top-layer hidden state.
        # (Dropout in eval mode is the identity.)
        @pl.when(k == pl.num_programs(0) - 1)
        def _final():
            wout = w_refs[3 * num_layers][...]      # (H, O)
            bout = w_refs[3 * num_layers + 1][...]  # (1, O)
            h_last = state[2 * (num_layers - 1)][...]
            out_ref[...] = (jnp.dot(h_last.astype(wout.dtype), wout,
                                    preferred_element_type=jnp.float32)
                            + bout).astype(out_ref.dtype)

    return kernel


# ----------------------------------------------------------------------------
# Model forward (mirrors LSTMModel.forward with h0 = c0 = 0).
# ----------------------------------------------------------------------------
def lstm_model_forward(x_btd, params, *, max_chunk=64, unroll=4):
    """x_btd: (B, T, D) batch-first, as in PyTorch."""
    B, T, D = x_btd.shape
    lstm_params = params["lstm"]
    num_layers = len(lstm_params)
    H = lstm_params[0][1].shape[0]                  # W_hh^T is (H, 4H)
    w_out_t = params["w_out_t"]
    b_out = params["b_out"]
    O = w_out_t.shape[1]

    b_pad = _round_up(B, 8)                         # sublane multiple -> aligned row blocks
    tc = min(T, max_chunk)
    n_chunks = -(-T // tc)
    t_pad = n_chunks * tc

    # Time-major, batch/time padded, flattened so every chunk is a single aligned 2-D
    # (Tc*b_pad, D) slab with row index = t * b_pad + b.
    x = jnp.transpose(x_btd, (1, 0, 2))
    x = jnp.pad(x, ((0, t_pad - T), (0, b_pad - B), (0, 0)))
    x2d = x.reshape(t_pad * b_pad, D)

    inputs = [x2d]
    in_specs = [pl.BlockSpec((tc * b_pad, D), lambda k: (k, 0))]
    for (wih_t, whh_t, bias2d) in lstm_params:
        inputs += [wih_t, whh_t, bias2d]
        in_specs += [pl.BlockSpec(wih_t.shape, lambda k: (0, 0)),
                     pl.BlockSpec(whh_t.shape, lambda k: (0, 0)),
                     pl.BlockSpec(bias2d.shape, lambda k: (0, 0))]
    inputs += [w_out_t, b_out]
    in_specs += [pl.BlockSpec(w_out_t.shape, lambda k: (0, 0)),
                 pl.BlockSpec(b_out.shape, lambda k: (0, 0))]

    kernel = _make_fused_kernel(num_layers, H, tc, b_pad, T,
                                masked_tail=(t_pad != T), unroll=unroll)

    scratch_shapes = (
        [pltpu.VMEM((b_pad, H), jnp.float32) for _ in range(2 * num_layers)]
        + [pltpu.VMEM((tc * b_pad, 4 * H), jnp.float32),   # chunk-wide input projection
           pltpu.VMEM((tc * b_pad, H), jnp.float32)]       # layer output sequence
    )

    out = pl.pallas_call(
        kernel,
        out_shape=jax.ShapeDtypeStruct((b_pad, O), jnp.float32),
        grid_spec=pltpu.PrefetchScalarGridSpec(
            num_scalar_prefetch=0,
            grid=(n_chunks,),
            in_specs=in_specs,
            out_specs=pl.BlockSpec((b_pad, O), lambda k: (0, 0)),
            scratch_shapes=scratch_shapes,
        ),
        compiler_params=pltpu.CompilerParams(
            dimension_semantics=("arbitrary",),      # time is inherently sequential
            vmem_limit_bytes=32 * 1024 * 1024,       # >= v5e's 16 MiB default, safe on v7x
        ),
    )(*inputs)
    return out[:B]


# ----------------------------------------------------------------------------
# Parameters: raw PyTorch-style params + kernel-layout preparation.
# ----------------------------------------------------------------------------
def init_raw_params(key, input_dim, hidden_dim, layer_dim, output_dim):
    """PyTorch-style U(-1/sqrt(H), 1/sqrt(H)) initialization, gate order [i, f, g, o]."""
    raw = {"lstm": []}
    bound = 1.0 / (hidden_dim ** 0.5)
    for layer in range(layer_dim):
        in_dim = input_dim if layer == 0 else hidden_dim
        key, k1, k2, k3, k4 = jax.random.split(key, 5)
        w_ih = jax.random.uniform(k1, (4 * hidden_dim, in_dim),
                                  minval=-bound, maxval=bound, dtype=jnp.float32)
        w_hh = jax.random.uniform(k2, (4 * hidden_dim, hidden_dim),
                                  minval=-bound, maxval=bound, dtype=jnp.float32)
        b_ih = jax.random.uniform(k3, (4 * hidden_dim,),
                                  minval=-bound, maxval=bound, dtype=jnp.float32)
        b_hh = jax.random.uniform(k4, (4 * hidden_dim,),
                                  minval=-bound, maxval=bound, dtype=jnp.float32)
        raw["lstm"].append((w_ih, w_hh, b_ih, b_hh))
    key, k5, k6 = jax.random.split(key, 3)
    w_out = jax.random.uniform(k5, (output_dim, hidden_dim),
                               minval=-bound, maxval=bound, dtype=jnp.float32)
    b_out = jax.random.uniform(k6, (output_dim,),
                               minval=-bound, maxval=bound, dtype=jnp.float32)
    raw["linear"] = (w_out, b_out)
    return raw


def prepare_kernel_params(raw, dtype=jnp.float32):
    """Kernel layout: transposed weights (x @ W on the MXU), fused b_ih+b_hh, and the
    i/f/o gate columns pre-scaled by 0.5 so one full-width tanh recovers every gate.
    Set dtype=jnp.bfloat16 for full-rate MXU / half the weight VMEM (relax tolerances)."""
    H = raw["lstm"][0][1].shape[1]
    scale = jnp.concatenate([
        jnp.full((2 * H,), 0.5, jnp.float32),   # i, f
        jnp.ones((H,), jnp.float32),            # g (stays plain tanh)
        jnp.full((H,), 0.5, jnp.float32),       # o
    ])
    params = {"lstm": []}
    for (w_ih, w_hh, b_ih, b_hh) in raw["lstm"]:
        wih_t = (w_ih * scale[:, None]).T.astype(dtype)
        whh_t = (w_hh * scale[:, None]).T.astype(dtype)
        bias = ((b_ih + b_hh) * scale).reshape(1, -1).astype(jnp.float32)
        params["lstm"].append((wih_t, whh_t, bias))
    w_out, b_out = raw["linear"]
    params["w_out_t"] = w_out.T.astype(dtype)
    params["b_out"] = b_out.reshape(1, -1).astype(jnp.float32)
    return params


# ----------------------------------------------------------------------------
# Pure-JAX reference (lax.scan, standard sigmoid/tanh) for the correctness check.
# ----------------------------------------------------------------------------
def reference_forward(x_btd, raw_params):
    h_seq = jnp.transpose(x_btd, (1, 0, 2)).astype(jnp.float32)   # (T, B, D)
    for (w_ih, w_hh, b_ih, b_hh) in raw_params["lstm"]:
        H = w_hh.shape[1]
        B = h_seq.shape[1]

        def step(carry, x_t, w_ih=w_ih, w_hh=w_hh, b=b_ih + b_hh, H=H):
            h, c = carry
            z = x_t @ w_ih.T + h @ w_hh.T + b
            i = jax.nn.sigmoid(z[:, 0 * H:1 * H])
            f = jax.nn.sigmoid(z[:, 1 * H:2 * H])
            g = jnp.tanh(z[:, 2 * H:3 * H])
            o = jax.nn.sigmoid(z[:, 3 * H:4 * H])
            c = f * c + i * g
            h = o * jnp.tanh(c)
            return (h, c), h

        init = (jnp.zeros((B, H), jnp.float32), jnp.zeros((B, H), jnp.float32))
        _, h_seq = jax.lax.scan(step, init, h_seq)
    w_out, b_out = raw_params["linear"]
    return h_seq[-1] @ w_out.T + b_out


if __name__ == "__main__":
    # Small shapes consistent with the module's forward: x is (batch, seq, input_dim).
    B, T, D, H, L, O = 2, 8, 16, 32, 2, 10

    key = jax.random.PRNGKey(0)
    k_x, k_p = jax.random.split(key)
    x = jax.random.normal(k_x, (B, T, D), dtype=jnp.float32)

    raw = init_raw_params(k_p, D, H, L, O)
    params = prepare_kernel_params(raw)              # f32 weights (flip to bf16 if desired)

    # max_chunk=4 -> two time chunks, so the VMEM-resident h/c carry across the sequential
    # grid axis is exercised as well as the in-chunk recurrence.
    fwd = jax.jit(functools.partial(lstm_model_forward, max_chunk=4, unroll=4))
    out = jax.block_until_ready(fwd(x, params))

    ref = reference_forward(x, raw)
    assert out.shape == (B, O), out.shape
    max_err = float(jnp.max(jnp.abs(out - ref)))
    assert jnp.allclose(out, ref, atol=2e-4, rtol=2e-4), \
        f"mismatch vs pure-JAX reference (max |err| = {max_err})"
    print("KERNEL_OK")
</pallas_src>

<mosaic_0001>
module attributes {stable_mosaic.version = 11 : i64} {
  func.func @kernel(%arg0: i32, %arg1: memref<32x16xf32, #tpu.memory_space<vmem>>, %arg2: memref<16x128xf32, #tpu.memory_space<vmem>>, %arg3: memref<32x128xf32, #tpu.memory_space<vmem>>, %arg4: memref<1x128xf32, #tpu.memory_space<vmem>>, %arg5: memref<32x128xf32, #tpu.memory_space<vmem>>, %arg6: memref<32x128xf32, #tpu.memory_space<vmem>>, %arg7: memref<1x128xf32, #tpu.memory_space<vmem>>, %arg8: memref<32x10xf32, #tpu.memory_space<vmem>>, %arg9: memref<1x10xf32, #tpu.memory_space<vmem>>, %arg10: memref<8x10xf32, #tpu.memory_space<vmem>>, %arg11: memref<8x32xf32, #tpu.memory_space<vmem>>, %arg12: memref<8x32xf32, #tpu.memory_space<vmem>>, %arg13: memref<8x32xf32, #tpu.memory_space<vmem>>, %arg14: memref<8x32xf32, #tpu.memory_space<vmem>>, %arg15: memref<32x128xf32, #tpu.memory_space<vmem>>, %arg16: memref<32x32xf32, #tpu.memory_space<vmem>>) attributes {dimension_semantics = [#tpu.dimension_semantics<arbitrary>], iteration_bounds = array<i64: 2>, scalar_prefetch = 0 : i64, scratch_operands = 6 : i64, tpu.core_type = #tpu.core_type<tc>, window_params = [{transform_indices = @transform_0, window_bounds = array<i64: 32, 16>}, {pipeline_mode = #tpu.pipeline_mode<synchronous>, transform_indices = @transform_1, window_bounds = array<i64: 16, 128>}, {pipeline_mode = #tpu.pipeline_mode<synchronous>, transform_indices = @transform_2, window_bounds = array<i64: 32, 128>}, {pipeline_mode = #tpu.pipeline_mode<synchronous>, transform_indices = @transform_3, window_bounds = array<i64: 1, 128>}, {pipeline_mode = #tpu.pipeline_mode<synchronous>, transform_indices = @transform_4, window_bounds = array<i64: 32, 128>}, {pipeline_mode = #tpu.pipeline_mode<synchronous>, transform_indices = @transform_5, window_bounds = array<i64: 32, 128>}, {pipeline_mode = #tpu.pipeline_mode<synchronous>, transform_indices = @transform_6, window_bounds = array<i64: 1, 128>}, {pipeline_mode = #tpu.pipeline_mode<synchronous>, transform_indices = @transform_7, window_bounds = array<i64: 32, 10>}, {pipeline_mode = #tpu.pipeline_mode<synchronous>, transform_indices = @transform_8, window_bounds = array<i64: 1, 10>}, {pipeline_mode = #tpu.pipeline_mode<synchronous>, transform_indices = @transform_9, window_bounds = array<i64: 8, 10>}]} {
    %c0_i32 = arith.constant 0 : i32
    %0 = arith.cmpi eq, %arg0, %c0_i32 : i32
    %1 = arith.extui %0 : i1 to i32
    %c0_i32_0 = arith.constant 0 : i32
    %2 = arith.cmpi ne, %1, %c0_i32_0 : i32
    scf.if %2 {
      %cst_120 = arith.constant 0.000000e+00 : f32
      %262 = vector.broadcast %cst_120 : f32 to vector<8x32xf32>
      %c0_121 = arith.constant 0 : index
      %c0_122 = arith.constant 0 : index
      %263 = vector.load %arg11[%c0_121, %c0_122] : memref<8x32xf32, #tpu.memory_space<vmem>>, vector<8x32xf32>
      tpu.vector_store %arg11[%c0_121, %c0_122], %262 {strides = array<i32>} : memref<8x32xf32, #tpu.memory_space<vmem>>, vector<8x32xf32>,
      %cst_123 = arith.constant 0.000000e+00 : f32
      %264 = vector.broadcast %cst_123 : f32 to vector<8x32xf32>
      %c0_124 = arith.constant 0 : index
      %c0_125 = arith.constant 0 : index
      %265 = vector.load %arg12[%c0_124, %c0_125] : memref<8x32xf32, #tpu.memory_space<vmem>>, vector<8x32xf32>
      tpu.vector_store %arg12[%c0_124, %c0_125], %264 {strides = array<i32>} : memref<8x32xf32, #tpu.memory_space<vmem>>, vector<8x32xf32>,
      %cst_126 = arith.constant 0.000000e+00 : f32
      %266 = vector.broadcast %cst_126 : f32 to vector<8x32xf32>
      %c0_127 = arith.constant 0 : index
      %c0_128 = arith.constant 0 : index
      %267 = vector.load %arg13[%c0_127, %c0_128] : memref<8x32xf32, #tpu.memory_space<vmem>>, vector<8x32xf32>
      tpu.vector_store %arg13[%c0_127, %c0_128], %266 {strides = array<i32>} : memref<8x32xf32, #tpu.memory_space<vmem>>, vector<8x32xf32>,
      %cst_129 = arith.constant 0.000000e+00 : f32
      %268 = vector.broadcast %cst_129 : f32 to vector<8x32xf32>
      %c0_130 = arith.constant 0 : index
      %c0_131 = arith.constant 0 : index
      %269 = vector.load %arg14[%c0_130, %c0_131] : memref<8x32xf32, #tpu.memory_space<vmem>>, vector<8x32xf32>
      tpu.vector_store %arg14[%c0_130, %c0_131], %268 {strides = array<i32>} : memref<8x32xf32, #tpu.memory_space<vmem>>, vector<8x32xf32>,
    } else {
    }
    %c0 = arith.constant 0 : index
    %c0_1 = arith.constant 0 : index
    %3 = vector.load %arg2[%c0, %c0_1] : memref<16x128xf32, #tpu.memory_space<vmem>>, vector<16x128xf32>
    %c0_2 = arith.constant 0 : index
    %c0_3 = arith.constant 0 : index
    %4 = vector.load %arg3[%c0_2, %c0_3] : memref<32x128xf32, #tpu.memory_space<vmem>>, vector<32x128xf32>
    %c0_4 = arith.constant 0 : index
    %c0_5 = arith.constant 0 : index
    %5 = vector.load %arg4[%c0_4, %c0_5] : memref<1x128xf32, #tpu.memory_space<vmem>>, vector<1x128xf32>
    %c0_6 = arith.constant 0 : index
    %c0_7 = arith.constant 0 : index
    %6 = vector.load %arg1[%c0_6, %c0_7] : memref<32x16xf32, #tpu.memory_space<vmem>>, vector<32x16xf32>
    %cst = arith.constant dense<0.000000e+00> : vector<32x128xf32>
    %7 = tpu.matmul %6, %3, %cst {dimension_numbers = #tpu.dot_dimension_numbers<[1], [0], [0], [1], [0, 0, 1, 1], [], []>} : vector<32x16xf32>, vector<16x128xf32>, vector<32x128xf32> -> vector<32x128xf32>
    %8 = vector.broadcast %5 : vector<1x128xf32> to vector<32x128xf32>
    %9 = arith.addf %7, %8 : vector<32x128xf32>
    %c0_8 = arith.constant 0 : index
    %c0_9 = arith.constant 0 : index
    %10 = vector.load %arg15[%c0_8, %c0_9] : memref<32x128xf32, #tpu.memory_space<vmem>>, vector<32x128xf32>
    tpu.vector_store %arg15[%c0_8, %c0_9], %9 {strides = array<i32>} : memref<32x128xf32, #tpu.memory_space<vmem>>, vector<32x128xf32>,
    %c0_10 = arith.constant 0 : index
    %c0_11 = arith.constant 0 : index
    %11 = vector.load %arg11[%c0_10, %c0_11] : memref<8x32xf32, #tpu.memory_space<vmem>>, vector<8x32xf32>
    %c0_12 = arith.constant 0 : index
    %c0_13 = arith.constant 0 : index
    %12 = vector.load %arg12[%c0_12, %c0_13] : memref<8x32xf32, #tpu.memory_space<vmem>>, vector<8x32xf32>
    %c0_i32_14 = arith.constant 0 : i32
    %c8_i32 = arith.constant 8 : i32
    %13 = arith.muli %c0_i32_14, %c8_i32 : i32
    %14 = tpu.assume_multiple %13, 8 : i32
    %15 = arith.index_cast %14 : i32 to index
    %c0_15 = arith.constant 0 : index
    %16 = vector.load %arg15[%15, %c0_15] : memref<32x128xf32, #tpu.memory_space<vmem>>, vector<8x128xf32>
    %cst_16 = arith.constant dense<0.000000e+00> : vector<8x128xf32>
    %17 = tpu.matmul %11, %4, %cst_16 {dimension_numbers = #tpu.dot_dimension_numbers<[1], [0], [0], [1], [0, 0, 1, 1], [], []>} : vector<8x32xf32>, vector<32x128xf32>, vector<8x128xf32> -> vector<8x128xf32>
    %18 = arith.addf %16, %17 : vector<8x128xf32>
    %19 = math.tanh %18 : vector<8x128xf32>
    %20 = vector.extract_strided_slice %19 {offsets = [0, 0], sizes = [8, 32], strides = [1, 1]} : vector<8x128xf32> to vector<8x32xf32>
    %cst_17 = arith.constant 5.000000e-01 : f32
    %21 = vector.broadcast %cst_17 : f32 to vector<8x32xf32>
    %22 = arith.mulf %21, %20 : vector<8x32xf32>
    %cst_18 = arith.constant 5.000000e-01 : f32
    %23 = vector.broadcast %cst_18 : f32 to vector<8x32xf32>
    %24 = arith.addf %22, %23 : vector<8x32xf32>
    %25 = vector.extract_strided_slice %19 {offsets = [0, 32], sizes = [8, 32], strides = [1, 1]} : vector<8x128xf32> to vector<8x32xf32>
    %cst_19 = arith.constant 5.000000e-01 : f32
    %26 = vector.broadcast %cst_19 : f32 to vector<8x32xf32>
    %27 = arith.mulf %26, %25 : vector<8x32xf32>
    %cst_20 = arith.constant 5.000000e-01 : f32
    %28 = vector.broadcast %cst_20 : f32 to vector<8x32xf32>
    %29 = arith.addf %27, %28 : vector<8x32xf32>
    %30 = vector.extract_strided_slice %19 {offsets = [0, 64], sizes = [8, 32], strides = [1, 1]} : vector<8x128xf32> to vector<8x32xf32>
    %31 = vector.extract_strided_slice %19 {offsets = [0, 96], sizes = [8, 32], strides = [1, 1]} : vector<8x128xf32> to vector<8x32xf32>
    %cst_21 = arith.constant 5.000000e-01 : f32
    %32 = vector.broadcast %cst_21 : f32 to vector<8x32xf32>
    %33 = arith.mulf %32, %31 : vector<8x32xf32>
    %cst_22 = arith.constant 5.000000e-01 : f32
    %34 = vector.broadcast %cst_22 : f32 to vector<8x32xf32>
    %35 = arith.addf %33, %34 : vector<8x32xf32>
    %36 = arith.mulf %29, %12 : vector<8x32xf32>
    %37 = arith.mulf %24, %30 : vector<8x32xf32>
    %38 = arith.addf %36, %37 : vector<8x32xf32>
    %39 = math.tanh %38 : vector<8x32xf32>
    %40 = arith.mulf %35, %39 : vector<8x32xf32>
    %41 = arith.index_cast %14 : i32 to index
    %c0_23 = arith.constant 0 : index
    %42 = vector.load %arg16[%41, %c0_23] : memref<32x32xf32, #tpu.memory_space<vmem>>, vector<8x32xf32>
    tpu.vector_store %arg16[%41, %c0_23], %40 {strides = array<i32>} : memref<32x32xf32, #tpu.memory_space<vmem>>, vector<8x32xf32>,
    %c1_i32 = arith.constant 1 : i32
    %c8_i32_24 = arith.constant 8 : i32
    %43 = arith.muli %c1_i32, %c8_i32_24 : i32
    %44 = tpu.assume_multiple %43, 8 : i32
    %45 = arith.index_cast %44 : i32 to index
    %c0_25 = arith.constant 0 : index
    %46 = vector.load %arg15[%45, %c0_25] : memref<32x128xf32, #tpu.memory_space<vmem>>, vector<8x128xf32>
    %cst_26 = arith.constant dense<0.000000e+00> : vector<8x128xf32>
    %47 = tpu.matmul %40, %4, %cst_26 {dimension_numbers = #tpu.dot_dimension_numbers<[1], [0], [0], [1], [0, 0, 1, 1], [], []>} : vector<8x32xf32>, vector<32x128xf32>, vector<8x128xf32> -> vector<8x128xf32>
    %48 = arith.addf %46, %47 : vector<8x128xf32>
    %49 = math.tanh %48 : vector<8x128xf32>
    %50 = vector.extract_strided_slice %49 {offsets = [0, 0], sizes = [8, 32], strides = [1, 1]} : vector<8x128xf32> to vector<8x32xf32>
    %cst_27 = arith.constant 5.000000e-01 : f32
    %51 = vector.broadcast %cst_27 : f32 to vector<8x32xf32>
    %52 = arith.mulf %51, %50 : vector<8x32xf32>
    %cst_28 = arith.constant 5.000000e-01 : f32
    %53 = vector.broadcast %cst_28 : f32 to vector<8x32xf32>
    %54 = arith.addf %52, %53 : vector<8x32xf32>
    %55 = vector.extract_strided_slice %49 {offsets = [0, 32], sizes = [8, 32], strides = [1, 1]} : vector<8x128xf32> to vector<8x32xf32>
    %cst_29 = arith.constant 5.000000e-01 : f32
    %56 = vector.broadcast %cst_29 : f32 to vector<8x32xf32>
    %57 = arith.mulf %56, %55 : vector<8x32xf32>
    %cst_30 = arith.constant 5.000000e-01 : f32
    %58 = vector.broadcast %cst_30 : f32 to vector<8x32xf32>
    %59 = arith.addf %57, %58 : vector<8x32xf32>
    %60 = vector.extract_strided_slice %49 {offsets = [0, 64], sizes = [8, 32], strides = [1, 1]} : vector<8x128xf32> to vector<8x32xf32>
    %61 = vector.extract_strided_slice %49 {offsets = [0, 96], sizes = [8, 32], strides = [1, 1]} : vector<8x128xf32> to vector<8x32xf32>
    %cst_31 = arith.constant 5.000000e-01 : f32
    %62 = vector.broadcast %cst_31 : f32 to vector<8x32xf32>
    %63 = arith.mulf %62, %61 : vector<8x32xf32>
    %cst_32 = arith.constant 5.000000e-01 : f32
    %64 = vector.broadcast %cst_32 : f32 to vector<8x32xf32>
    %65 = arith.addf %63, %64 : vector<8x32xf32>
    %66 = arith.mulf %59, %38 : vector<8x32xf32>
    %67 = arith.mulf %54, %60 : vector<8x32xf32>
    %68 = arith.addf %66, %67 : vector<8x32xf32>
    %69 = math.tanh %68 : vector<8x32xf32>
    %70 = arith.mulf %65, %69 : vector<8x32xf32>
    %71 = arith.index_cast %44 : i32 to index
    %c0_33 = arith.constant 0 : index
    %72 = vector.load %arg16[%71, %c0_33] : memref<32x32xf32, #tpu.memory_space<vmem>>, vector<8x32xf32>
    tpu.vector_store %arg16[%71, %c0_33], %70 {strides = array<i32>} : memref<32x32xf32, #tpu.memory_space<vmem>>, vector<8x32xf32>,
    %c2_i32 = arith.constant 2 : i32
    %c8_i32_34 = arith.constant 8 : i32
    %73 = arith.muli %c2_i32, %c8_i32_34 : i32
    %74 = tpu.assume_multiple %73, 8 : i32
    %75 = arith.index_cast %74 : i32 to index
    %c0_35 = arith.constant 0 : index
    %76 = vector.load %arg15[%75, %c0_35] : memref<32x128xf32, #tpu.memory_space<vmem>>, vector<8x128xf32>
    %cst_36 = arith.constant dense<0.000000e+00> : vector<8x128xf32>
    %77 = tpu.matmul %70, %4, %cst_36 {dimension_numbers = #tpu.dot_dimension_numbers<[1], [0], [0], [1], [0, 0, 1, 1], [], []>} : vector<8x32xf32>, vector<32x128xf32>, vector<8x128xf32> -> vector<8x128xf32>
    %78 = arith.addf %76, %77 : vector<8x128xf32>
    %79 = math.tanh %78 : vector<8x128xf32>
    %80 = vector.extract_strided_slice %79 {offsets = [0, 0], sizes = [8, 32], strides = [1, 1]} : vector<8x128xf32> to vector<8x32xf32>
    %cst_37 = arith.constant 5.000000e-01 : f32
    %81 = vector.broadcast %cst_37 : f32 to vector<8x32xf32>
    %82 = arith.mulf %81, %80 : vector<8x32xf32>
    %cst_38 = arith.constant 5.000000e-01 : f32
    %83 = vector.broadcast %cst_38 : f32 to vector<8x32xf32>
    %84 = arith.addf %82, %83 : vector<8x32xf32>
    %85 = vector.extract_strided_slice %79 {offsets = [0, 32], sizes = [8, 32], strides = [1, 1]} : vector<8x128xf32> to vector<8x32xf32>
    %cst_39 = arith.constant 5.000000e-01 : f32
    %86 = vector.broadcast %cst_39 : f32 to vector<8x32xf32>
    %87 = arith.mulf %86, %85 : vector<8x32xf32>
    %cst_40 = arith.constant 5.000000e-01 : f32
    %88 = vector.broadcast %cst_40 : f32 to vector<8x32xf32>
    %89 = arith.addf %87, %88 : vector<8x32xf32>
    %90 = vector.extract_strided_slice %79 {offsets = [0, 64], sizes = [8, 32], strides = [1, 1]} : vector<8x128xf32> to vector<8x32xf32>
    %91 = vector.extract_strided_slice %79 {offsets = [0, 96], sizes = [8, 32], strides = [1, 1]} : vector<8x128xf32> to vector<8x32xf32>
    %cst_41 = arith.constant 5.000000e-01 : f32
    %92 = vector.broadcast %cst_41 : f32 to vector<8x32xf32>
    %93 = arith.mulf %92, %91 : vector<8x32xf32>
    %cst_42 = arith.constant 5.000000e-01 : f32
    %94 = vector.broadcast %cst_42 : f32 to vector<8x32xf32>
    %95 = arith.addf %93, %94 : vector<8x32xf32>
    %96 = arith.mulf %89, %68 : vector<8x32xf32>
    %97 = arith.mulf %84, %90 : vector<8x32xf32>
    %98 = arith.addf %96, %97 : vector<8x32xf32>
    %99 = math.tanh %98 : vector<8x32xf32>
    %100 = arith.mulf %95, %99 : vector<8x32xf32>
    %101 = arith.index_cast %74 : i32 to index
    %c0_43 = arith.constant 0 : index
    %102 = vector.load %arg16[%101, %c0_43] : memref<32x32xf32, #tpu.memory_space<vmem>>, vector<8x32xf32>
    tpu.vector_store %arg16[%101, %c0_43], %100 {strides = array<i32>} : memref<32x32xf32, #tpu.memory_space<vmem>>, vector<8x32xf32>,
    %c3_i32 = arith.constant 3 : i32
    %c8_i32_44 = arith.constant 8 : i32
    %103 = arith.muli %c3_i32, %c8_i32_44 : i32
    %104 = tpu.assume_multiple %103, 8 : i32
    %105 = arith.index_cast %104 : i32 to index
    %c0_45 = arith.constant 0 : index
    %106 = vector.load %arg15[%105, %c0_45] : memref<32x128xf32, #tpu.memory_space<vmem>>, vector<8x128xf32>
    %cst_46 = arith.constant dense<0.000000e+00> : vector<8x128xf32>
    %107 = tpu.matmul %100, %4, %cst_46 {dimension_numbers = #tpu.dot_dimension_numbers<[1], [0], [0], [1], [0, 0, 1, 1], [], []>} : vector<8x32xf32>, vector<32x128xf32>, vector<8x128xf32> -> vector<8x128xf32>
    %108 = arith.addf %106, %107 : vector<8x128xf32>
    %109 = math.tanh %108 : vector<8x128xf32>
    %110 = vector.extract_strided_slice %109 {offsets = [0, 0], sizes = [8, 32], strides = [1, 1]} : vector<8x128xf32> to vector<8x32xf32>
    %cst_47 = arith.constant 5.000000e-01 : f32
    %111 = vector.broadcast %cst_47 : f32 to vector<8x32xf32>
    %112 = arith.mulf %111, %110 : vector<8x32xf32>
    %cst_48 = arith.constant 5.000000e-01 : f32
    %113 = vector.broadcast %cst_48 : f32 to vector<8x32xf32>
    %114 = arith.addf %112, %113 : vector<8x32xf32>
    %115 = vector.extract_strided_slice %109 {offsets = [0, 32], sizes = [8, 32], strides = [1, 1]} : vector<8x128xf32> to vector<8x32xf32>
    %cst_49 = arith.constant 5.000000e-01 : f32
    %116 = vector.broadcast %cst_49 : f32 to vector<8x32xf32>
    %117 = arith.mulf %116, %115 : vector<8x32xf32>
    %cst_50 = arith.constant 5.000000e-01 : f32
    %118 = vector.broadcast %cst_50 : f32 to vector<8x32xf32>
    %119 = arith.addf %117, %118 : vector<8x32xf32>
    %120 = vector.extract_strided_slice %109 {offsets = [0, 64], sizes = [8, 32], strides = [1, 1]} : vector<8x128xf32> to vector<8x32xf32>
    %121 = vector.extract_strided_slice %109 {offsets = [0, 96], sizes = [8, 32], strides = [1, 1]} : vector<8x128xf32> to vector<8x32xf32>
    %cst_51 = arith.constant 5.000000e-01 : f32
    %122 = vector.broadcast %cst_51 : f32 to vector<8x32xf32>
    %123 = arith.mulf %122, %121 : vector<8x32xf32>
    %cst_52 = arith.constant 5.000000e-01 : f32
    %124 = vector.broadcast %cst_52 : f32 to vector<8x32xf32>
    %125 = arith.addf %123, %124 : vector<8x32xf32>
    %126 = arith.mulf %119, %98 : vector<8x32xf32>
    %127 = arith.mulf %114, %120 : vector<8x32xf32>
    %128 = arith.addf %126, %127 : vector<8x32xf32>
    %129 = math.tanh %128 : vector<8x32xf32>
    %130 = arith.mulf %125, %129 : vector<8x32xf32>
    %131 = arith.index_cast %104 : i32 to index
    %c0_53 = arith.constant 0 : index
    %132 = vector.load %arg16[%131, %c0_53] : memref<32x32xf32, #tpu.memory_space<vmem>>, vector<8x32xf32>
    tpu.vector_store %arg16[%131, %c0_53], %130 {strides = array<i32>} : memref<32x32xf32, #tpu.memory_space<vmem>>, vector<8x32xf32>,
    %c4_i32 = arith.constant 4 : i32
    %c0_54 = arith.constant 0 : index
    %c0_55 = arith.constant 0 : index
    %133 = vector.load %arg11[%c0_54, %c0_55] : memref<8x32xf32, #tpu.memory_space<vmem>>, vector<8x32xf32>
    tpu.vector_store %arg11[%c0_54, %c0_55], %130 {strides = array<i32>} : memref<8x32xf32, #tpu.memory_space<vmem>>, vector<8x32xf32>,
    %c0_56 = arith.constant 0 : index
    %c0_57 = arith.constant 0 : index
    %134 = vector.load %arg12[%c0_56, %c0_57] : memref<8x32xf32, #tpu.memory_space<vmem>>, vector<8x32xf32>
    tpu.vector_store %arg12[%c0_56, %c0_57], %128 {strides = array<i32>} : memref<8x32xf32, #tpu.memory_space<vmem>>, vector<8x32xf32>,
    %c0_58 = arith.constant 0 : index
    %c0_59 = arith.constant 0 : index
    %135 = vector.load %arg5[%c0_58, %c0_59] : memref<32x128xf32, #tpu.memory_space<vmem>>, vector<32x128xf32>
    %c0_60 = arith.constant 0 : index
    %c0_61 = arith.constant 0 : index
    %136 = vector.load %arg6[%c0_60, %c0_61] : memref<32x128xf32, #tpu.memory_space<vmem>>, vector<32x128xf32>
    %c0_62 = arith.constant 0 : index
    %c0_63 = arith.constant 0 : index
    %137 = vector.load %arg7[%c0_62, %c0_63] : memref<1x128xf32, #tpu.memory_space<vmem>>, vector<1x128xf32>
    %c0_64 = arith.constant 0 : index
    %c0_65 = arith.constant 0 : index
    %138 = vector.load %arg16[%c0_64, %c0_65] : memref<32x32xf32, #tpu.memory_space<vmem>>, vector<32x32xf32>
    %cst_66 = arith.constant dense<0.000000e+00> : vector<32x128xf32>
    %139 = tpu.matmul %138, %135, %cst_66 {dimension_numbers = #tpu.dot_dimension_numbers<[1], [0], [0], [1], [0, 0, 1, 1], [], []>} : vector<32x32xf32>, vector<32x128xf32>, vector<32x128xf32> -> vector<32x128xf32>
    %140 = vector.broadcast %137 : vector<1x128xf32> to vector<32x128xf32>
    %141 = arith.addf %139, %140 : vector<32x128xf32>
    %c0_67 = arith.constant 0 : index
    %c0_68 = arith.constant 0 : index
    %142 = vector.load %arg15[%c0_67, %c0_68] : memref<32x128xf32, #tpu.memory_space<vmem>>, vector<32x128xf32>
    tpu.vector_store %arg15[%c0_67, %c0_68], %141 {strides = array<i32>} : memref<32x128xf32, #tpu.memory_space<vmem>>, vector<32x128xf32>,
    %c0_69 = arith.constant 0 : index
    %c0_70 = arith.constant 0 : index
    %143 = vector.load %arg13[%c0_69, %c0_70] : memref<8x32xf32, #tpu.memory_space<vmem>>, vector<8x32xf32>
    %c0_71 = arith.constant 0 : index
    %c0_72 = arith.constant 0 : index
    %144 = vector.load %arg14[%c0_71, %c0_72] : memref<8x32xf32, #tpu.memory_space<vmem>>, vector<8x32xf32>
    %c0_i32_73 = arith.constant 0 : i32
    %c8_i32_74 = arith.constant 8 : i32
    %145 = arith.muli %c0_i32_73, %c8_i32_74 : i32
    %146 = tpu.assume_multiple %145, 8 : i32
    %147 = arith.index_cast %146 : i32 to index
    %c0_75 = arith.constant 0 : index
    %148 = vector.load %arg15[%147, %c0_75] : memref<32x128xf32, #tpu.memory_space<vmem>>, vector<8x128xf32>
    %cst_76 = arith.constant dense<0.000000e+00> : vector<8x128xf32>
    %149 = tpu.matmul %143, %136, %cst_76 {dimension_numbers = #tpu.dot_dimension_numbers<[1], [0], [0], [1], [0, 0, 1, 1], [], []>} : vector<8x32xf32>, vector<32x128xf32>, vector<8x128xf32> -> vector<8x128xf32>
    %150 = arith.addf %148, %149 : vector<8x128xf32>
    %151 = math.tanh %150 : vector<8x128xf32>
    %152 = vector.extract_strided_slice %151 {offsets = [0, 0], sizes = [8, 32], strides = [1, 1]} : vector<8x128xf32> to vector<8x32xf32>
    %cst_77 = arith.constant 5.000000e-01 : f32
    %153 = vector.broadcast %cst_77 : f32 to vector<8x32xf32>
    %154 = arith.mulf %153, %152 : vector<8x32xf32>
    %cst_78 = arith.constant 5.000000e-01 : f32
    %155 = vector.broadcast %cst_78 : f32 to vector<8x32xf32>
    %156 = arith.addf %154, %155 : vector<8x32xf32>
    %157 = vector.extract_strided_slice %151 {offsets = [0, 32], sizes = [8, 32], strides = [1, 1]} : vector<8x128xf32> to vector<8x32xf32>
    %cst_79 = arith.constant 5.000000e-01 : f32
    %158 = vector.broadcast %cst_79 : f32 to vector<8x32xf32>
    %159 = arith.mulf %158, %157 : vector<8x32xf32>
    %cst_80 = arith.constant 5.000000e-01 : f32
    %160 = vector.broadcast %cst_80 : f32 to vector<8x32xf32>
    %161 = arith.addf %159, %160 : vector<8x32xf32>
    %162 = vector.extract_strided_slice %151 {offsets = [0, 64], sizes = [8, 32], strides = [1, 1]} : vector<8x128xf32> to vector<8x32xf32>
    %163 = vector.extract_strided_slice %151 {offsets = [0, 96], sizes = [8, 32], strides = [1, 1]} : vector<8x128xf32> to vector<8x32xf32>
    %cst_81 = arith.constant 5.000000e-01 : f32
    %164 = vector.broadcast %cst_81 : f32 to vector<8x32xf32>
    %165 = arith.mulf %164, %163 : vector<8x32xf32>
    %cst_82 = arith.constant 5.000000e-01 : f32
    %166 = vector.broadcast %cst_82 : f32 to vector<8x32xf32>
    %167 = arith.addf %165, %166 : vector<8x32xf32>
    %168 = arith.mulf %161, %144 : vector<8x32xf32>
    %169 = arith.mulf %156, %162 : vector<8x32xf32>
    %170 = arith.addf %168, %169 : vector<8x32xf32>
    %171 = math.tanh %170 : vector<8x32xf32>
    %172 = arith.mulf %167, %171 : vector<8x32xf32>
    %c1_i32_83 = arith.constant 1 : i32
    %c8_i32_84 = arith.constant 8 : i32
    %173 = arith.muli %c1_i32_83, %c8_i32_84 : i32
    %174 = tpu.assume_multiple %173, 8 : i32
    %175 = arith.index_cast %174 : i32 to index
    %c0_85 = arith.constant 0 : index
    %176 = vector.load %arg15[%175, %c0_85] : memref<32x128xf32, #tpu.memory_space<vmem>>, vector<8x128xf32>
    %cst_86 = arith.constant dense<0.000000e+00> : vector<8x128xf32>
    %177 = tpu.matmul %172, %136, %cst_86 {dimension_numbers = #tpu.dot_dimension_numbers<[1], [0], [0], [1], [0, 0, 1, 1], [], []>} : vector<8x32xf32>, vector<32x128xf32>, vector<8x128xf32> -> vector<8x128xf32>
    %178 = arith.addf %176, %177 : vector<8x128xf32>
    %179 = math.tanh %178 : vector<8x128xf32>
    %180 = vector.extract_strided_slice %179 {offsets = [0, 0], sizes = [8, 32], strides = [1, 1]} : vector<8x128xf32> to vector<8x32xf32>
    %cst_87 = arith.constant 5.000000e-01 : f32
    %181 = vector.broadcast %cst_87 : f32 to vector<8x32xf32>
    %182 = arith.mulf %181, %180 : vector<8x32xf32>
    %cst_88 = arith.constant 5.000000e-01 : f32
    %183 = vector.broadcast %cst_88 : f32 to vector<8x32xf32>
    %184 = arith.addf %182, %183 : vector<8x32xf32>
    %185 = vector.extract_strided_slice %179 {offsets = [0, 32], sizes = [8, 32], strides = [1, 1]} : vector<8x128xf32> to vector<8x32xf32>
    %cst_89 = arith.constant 5.000000e-01 : f32
    %186 = vector.broadcast %cst_89 : f32 to vector<8x32xf32>
    %187 = arith.mulf %186, %185 : vector<8x32xf32>
    %cst_90 = arith.constant 5.000000e-01 : f32
    %188 = vector.broadcast %cst_90 : f32 to vector<8x32xf32>
    %189 = arith.addf %187, %188 : vector<8x32xf32>
    %190 = vector.extract_strided_slice %179 {offsets = [0, 64], sizes = [8, 32], strides = [1, 1]} : vector<8x128xf32> to vector<8x32xf32>
    %191 = vector.extract_strided_slice %179 {offsets = [0, 96], sizes = [8, 32], strides = [1, 1]} : vector<8x128xf32> to vector<8x32xf32>
    %cst_91 = arith.constant 5.000000e-01 : f32
    %192 = vector.broadcast %cst_91 : f32 to vector<8x32xf32>
    %193 = arith.mulf %192, %191 : vector<8x32xf32>
    %cst_92 = arith.constant 5.000000e-01 : f32
    %194 = vector.broadcast %cst_92 : f32 to vector<8x32xf32>
    %195 = arith.addf %193, %194 : vector<8x32xf32>
    %196 = arith.mulf %189, %170 : vector<8x32xf32>
    %197 = arith.mulf %184, %190 : vector<8x32xf32>
    %198 = arith.addf %196, %197 : vector<8x32xf32>
    %199 = math.tanh %198 : vector<8x32xf32>
    %200 = arith.mulf %195, %199 : vector<8x32xf32>
    %c2_i32_93 = arith.constant 2 : i32
    %c8_i32_94 = arith.constant 8 : i32
    %201 = arith.muli %c2_i32_93, %c8_i32_94 : i32
    %202 = tpu.assume_multiple %201, 8 : i32
    %203 = arith.index_cast %202 : i32 to index
    %c0_95 = arith.constant 0 : index
    %204 = vector.load %arg15[%203, %c0_95] : memref<32x128xf32, #tpu.memory_space<vmem>>, vector<8x128xf32>
    %cst_96 = arith.constant dense<0.000000e+00> : vector<8x128xf32>
    %205 = tpu.matmul %200, %136, %cst_96 {dimension_numbers = #tpu.dot_dimension_numbers<[1], [0], [0], [1], [0, 0, 1, 1], [], []>} : vector<8x32xf32>, vector<32x128xf32>, vector<8x128xf32> -> vector<8x128xf32>
    %206 = arith.addf %204, %205 : vector<8x128xf32>
    %207 = math.tanh %206 : vector<8x128xf32>
    %208 = vector.extract_strided_slice %207 {offsets = [0, 0], sizes = [8, 32], strides = [1, 1]} : vector<8x128xf32> to vector<8x32xf32>
    %cst_97 = arith.constant 5.000000e-01 : f32
    %209 = vector.broadcast %cst_97 : f32 to vector<8x32xf32>
    %210 = arith.mulf %209, %208 : vector<8x32xf32>
    %cst_98 = arith.constant 5.000000e-01 : f32
    %211 = vector.broadcast %cst_98 : f32 to vector<8x32xf32>
    %212 = arith.addf %210, %211 : vector<8x32xf32>
    %213 = vector.extract_strided_slice %207 {offsets = [0, 32], sizes = [8, 32], strides = [1, 1]} : vector<8x128xf32> to vector<8x32xf32>
    %cst_99 = arith.constant 5.000000e-01 : f32
    %214 = vector.broadcast %cst_99 : f32 to vector<8x32xf32>
    %215 = arith.mulf %214, %213 : vector<8x32xf32>
    %cst_100 = arith.constant 5.000000e-01 : f32
    %216 = vector.broadcast %cst_100 : f32 to vector<8x32xf32>
    %217 = arith.addf %215, %216 : vector<8x32xf32>
    %218 = vector.extract_strided_slice %207 {offsets = [0, 64], sizes = [8, 32], strides = [1, 1]} : vector<8x128xf32> to vector<8x32xf32>
    %219 = vector.extract_strided_slice %207 {offsets = [0, 96], sizes = [8, 32], strides = [1, 1]} : vector<8x128xf32> to vector<8x32xf32>
    %cst_101 = arith.constant 5.000000e-01 : f32
    %220 = vector.broadcast %cst_101 : f32 to vector<8x32xf32>
    %221 = arith.mulf %220, %219 : vector<8x32xf32>
    %cst_102 = arith.constant 5.000000e-01 : f32
    %222 = vector.broadcast %cst_102 : f32 to vector<8x32xf32>
    %223 = arith.addf %221, %222 : vector<8x32xf32>
    %224 = arith.mulf %217, %198 : vector<8x32xf32>
    %225 = arith.mulf %212, %218 : vector<8x32xf32>
    %226 = arith.addf %224, %225 : vector<8x32xf32>
    %227 = math.tanh %226 : vector<8x32xf32>
    %228 = arith.mulf %223, %227 : vector<8x32xf32>
    %c3_i32_103 = arith.constant 3 : i32
    %c8_i32_104 = arith.constant 8 : i32
    %229 = arith.muli %c3_i32_103, %c8_i32_104 : i32
    %230 = tpu.assume_multiple %229, 8 : i32
    %231 = arith.index_cast %230 : i32 to index
    %c0_105 = arith.constant 0 : index
    %232 = vector.load %arg15[%231, %c0_105] : memref<32x128xf32, #tpu.memory_space<vmem>>, vector<8x128xf32>
    %cst_106 = arith.constant dense<0.000000e+00> : vector<8x128xf32>
    %233 = tpu.matmul %228, %136, %cst_106 {dimension_numbers = #tpu.dot_dimension_numbers<[1], [0], [0], [1], [0, 0, 1, 1], [], []>} : vector<8x32xf32>, vector<32x128xf32>, vector<8x128xf32> -> vector<8x128xf32>
    %234 = arith.addf %232, %233 : vector<8x128xf32>
    %235 = math.tanh %234 : vector<8x128xf32>
    %236 = vector.extract_strided_slice %235 {offsets = [0, 0], sizes = [8, 32], strides = [1, 1]} : vector<8x128xf32> to vector<8x32xf32>
    %cst_107 = arith.constant 5.000000e-01 : f32
    %237 = vector.broadcast %cst_107 : f32 to vector<8x32xf32>
    %238 = arith.mulf %237, %236 : vector<8x32xf32>
    %cst_108 = arith.constant 5.000000e-01 : f32
    %239 = vector.broadcast %cst_108 : f32 to vector<8x32xf32>
    %240 = arith.addf %238, %239 : vector<8x32xf32>
    %241 = vector.extract_strided_slice %235 {offsets = [0, 32], sizes = [8, 32], strides = [1, 1]} : vector<8x128xf32> to vector<8x32xf32>
    %cst_109 = arith.constant 5.000000e-01 : f32
    %242 = vector.broadcast %cst_109 : f32 to vector<8x32xf32>
    %243 = arith.mulf %242, %241 : vector<8x32xf32>
    %cst_110 = arith.constant 5.000000e-01 : f32
    %244 = vector.broadcast %cst_110 : f32 to vector<8x32xf32>
    %245 = arith.addf %243, %244 : vector<8x32xf32>
    %246 = vector.extract_strided_slice %235 {offsets = [0, 64], sizes = [8, 32], strides = [1, 1]} : vector<8x128xf32> to vector<8x32xf32>
    %247 = vector.extract_strided_slice %235 {offsets = [0, 96], sizes = [8, 32], strides = [1, 1]} : vector<8x128xf32> to vector<8x32xf32>
    %cst_111 = arith.constant 5.000000e-01 : f32
    %248 = vector.broadcast %cst_111 : f32 to vector<8x32xf32>
    %249 = arith.mulf %248, %247 : vector<8x32xf32>
    %cst_112 = arith.constant 5.000000e-01 : f32
    %250 = vector.broadcast %cst_112 : f32 to vector<8x32xf32>
    %251 = arith.addf %249, %250 : vector<8x32xf32>
    %252 = arith.mulf %245, %226 : vector<8x32xf32>
    %253 = arith.mulf %240, %246 : vector<8x32xf32>
    %254 = arith.addf %252, %253 : vector<8x32xf32>
    %255 = math.tanh %254 : vector<8x32xf32>
    %256 = arith.mulf %251, %255 : vector<8x32xf32>
    %c4_i32_113 = arith.constant 4 : i32
    %c0_114 = arith.constant 0 : index
    %c0_115 = arith.constant 0 : index
    %257 = vector.load %arg13[%c0_114, %c0_115] : memref<8x32xf32, #tpu.memory_space<vmem>>, vector<8x32xf32>
    tpu.vector_store %arg13[%c0_114, %c0_115], %256 {strides = array<i32>} : memref<8x32xf32, #tpu.memory_space<vmem>>, vector<8x32xf32>,
    %c0_116 = arith.constant 0 : index
    %c0_117 = arith.constant 0 : index
    %258 = vector.load %arg14[%c0_116, %c0_117] : memref<8x32xf32, #tpu.memory_space<vmem>>, vector<8x32xf32>
    tpu.vector_store %arg14[%c0_116, %c0_117], %254 {strides = array<i32>} : memref<8x32xf32, #tpu.memory_space<vmem>>, vector<8x32xf32>,
    %c1_i32_118 = arith.constant 1 : i32
    %259 = arith.cmpi eq, %arg0, %c1_i32_118 : i32
    %260 = arith.extui %259 : i1 to i32
    %c0_i32_119 = arith.constant 0 : i32
    %261 = arith.cmpi ne, %260, %c0_i32_119 : i32
    scf.if %261 {
      %c0_120 = arith.constant 0 : index
      %c0_121 = arith.constant 0 : index
      %262 = vector.load %arg8[%c0_120, %c0_121] : memref<32x10xf32, #tpu.memory_space<vmem>>, vector<32x10xf32>
      %c0_122 = arith.constant 0 : index
      %c0_123 = arith.constant 0 : index
      %263 = vector.load %arg9[%c0_122, %c0_123] : memref<1x10xf32, #tpu.memory_space<vmem>>, vector<1x10xf32>
      %c0_124 = arith.constant 0 : index
      %c0_125 = arith.constant 0 : index
      %264 = vector.load %arg13[%c0_124, %c0_125] : memref<8x32xf32, #tpu.memory_space<vmem>>, vector<8x32xf32>
      %cst_126 = arith.constant dense<0.000000e+00> : vector<8x10xf32>
      %265 = tpu.matmul %264, %262, %cst_126 {dimension_numbers = #tpu.dot_dimension_numbers<[1], [0], [0], [1], [0, 0, 1, 1], [], []>} : vector<8x32xf32>, vector<32x10xf32>, vector<8x10xf32> -> vector<8x10xf32>
      %266 = vector.broadcast %263 : vector<1x10xf32> to vector<8x10xf32>
      %267 = arith.addf %265, %266 : vector<8x10xf32>
      %c0_127 = arith.constant 0 : index
      %c0_128 = arith.constant 0 : index
      %268 = vector.load %arg10[%c0_127, %c0_128] : memref<8x10xf32, #tpu.memory_space<vmem>>, vector<8x10xf32>
      tpu.vector_store %arg10[%c0_127, %c0_128], %267 {strides = array<i32>} : memref<8x10xf32, #tpu.memory_space<vmem>>, vector<8x10xf32>,
    } else {
    }
    return
  }
  func.func @transform_0(%arg0: i32) -> (i32, i32) {
    %c0_i32 = arith.constant 0 : i32
    %c0_i32_0 = arith.constant 0 : i32
    return %arg0, %c0_i32 : i32, i32
  }
  func.func @transform_1(%arg0: i32) -> (i32, i32) {
    %c0_i32 = arith.constant 0 : i32
    %c0_i32_0 = arith.constant 0 : i32
    %c0_i32_1 = arith.constant 0 : i32
    return %c0_i32, %c0_i32_0 : i32, i32
  }
  func.func @transform_2(%arg0: i32) -> (i32, i32) {
    %c0_i32 = arith.constant 0 : i32
    %c0_i32_0 = arith.constant 0 : i32
    %c0_i32_1 = arith.constant 0 : i32
    return %c0_i32, %c0_i32_0 : i32, i32
  }
  func.func @transform_3(%arg0: i32) -> (i32, i32) {
    %c0_i32 = arith.constant 0 : i32
    %c0_i32_0 = arith.constant 0 : i32
    %c0_i32_1 = arith.constant 0 : i32
    return %c0_i32, %c0_i32_0 : i32, i32
  }
  func.func @transform_4(%arg0: i32) -> (i32, i32) {
    %c0_i32 = arith.constant 0 : i32
    %c0_i32_0 = arith.constant 0 : i32
    %c0_i32_1 = arith.constant 0 : i32
    return %c0_i32, %c0_i32_0 : i32, i32
  }
  func.func @transform_5(%arg0: i32) -> (i32, i32) {
    %c0_i32 = arith.constant 0 : i32
    %c0_i32_0 = arith.constant 0 : i32
    %c0_i32_1 = arith.constant 0 : i32
    return %c0_i32, %c0_i32_0 : i32, i32
  }
  func.func @transform_6(%arg0: i32) -> (i32, i32) {
    %c0_i32 = arith.constant 0 : i32
    %c0_i32_0 = arith.constant 0 : i32
    %c0_i32_1 = arith.constant 0 : i32
    return %c0_i32, %c0_i32_0 : i32, i32
  }
  func.func @transform_7(%arg0: i32) -> (i32, i32) {
    %c0_i32 = arith.constant 0 : i32
    %c0_i32_0 = arith.constant 0 : i32
    %c0_i32_1 = arith.constant 0 : i32
    return %c0_i32, %c0_i32_0 : i32, i32
  }
  func.func @transform_8(%arg0: i32) -> (i32, i32) {
    %c0_i32 = arith.constant 0 : i32
    %c0_i32_0 = arith.constant 0 : i32
    %c0_i32_1 = arith.constant 0 : i32
    return %c0_i32, %c0_i32_0 : i32, i32
  }
  func.func @transform_9(%arg0: i32) -> (i32, i32) {
    %c0_i32 = arith.constant 0 : i32
    %c0_i32_0 = arith.constant 0 : i32
    %c0_i32_1 = arith.constant 0 : i32
    return %c0_i32, %c0_i32_0 : i32, i32
  }
}

</mosaic_0001>

<bundles_post_ra>
// kernel: lstm_model_forward.1
= control target key start
LH: loop header
LB: loop body
LE: loop exit
PB: predicated region body
PF: predicated region fallthrough
CT: control target
= control target key end

     0   :  { %s1901_s30 = smov 0   ;;  %s2123_s0 = inlined_call_operand.vmem [shape: f32[64,16], index: 0, kind: input, shape index: {}]   ;;  %s2124_s1 = inlined_call_operand.vmem [shape: f32[16,128], index: 1, kind: input, shape index: {}]   ;;  %s2125_s2 = inlined_call_operand.vmem [shape: f32[32,128], index: 2, kind: input, shape index: {}]   ;;  %s2126_s3 = inlined_call_operand.vmem [shape: f32[1,128], index: 3, kind: input, shape index: {}]   ;;  %s2127_s4 = inlined_call_operand.vmem [shape: f32[32,128], index: 4, kind: input, shape index: {}]   ;;  %s2128_s5 = inlined_call_operand.vmem [shape: f32[32,128], index: 5, kind: input, shape index: {}]   ;;  %s2129_s6 = inlined_call_operand.vmem [shape: f32[1,128], index: 6, kind: input, shape index: {}]   ;;  %s2130_s7 = inlined_call_operand.vmem [shape: f32[32,10], index: 7, kind: input, shape index: {}]   ;;  %s2131_s8 = inlined_call_operand.vmem [shape: f32[1,10], index: 8, kind: input, shape index: {}]   ;;  %s2132_s9 = inlined_call_operand.vmem [shape: f32[8,10], index: 9, kind: output, shape index: {}]  }
   0x1 LB: > { %s1907_s10 = sadd.s32 4294967295, %s1839_s30   ;;  %p1508_p0 = scmp.ge.s32.totalorder %s1839_s30, 1  ;;  %s1839_s30 = sphi %s1901_s30, %s19_s30  }
   0x2   : > { %p283_p1 = scmp.lt.s32.totalorder %s1839_s30, 3 }
   0x4   : > { %p284_p2 = pnand %p1508_p0, %p283_p1 }
   0x5   : > { %s1509_s11 = sshll.u32 (!%p284_p2), %s1907_s10, 2  ;;  %p1511_p4 = scmp.ne.s32.totalorder (!%p284_p2), %s1907_s10, 0 }
   0x6   : > { %287 = sbr.rel (%p284_p2) target bundleno = 5180 (0x143c), region = 56  ;;  %p315_p3 = scmp.lt.s32.totalorder (!%p284_p2), %s1509_s11, 7 }
   0xd   : > { %s2134_s11 = smov (!%p315_p3, %s1509_s11), 7  ;;  %323 = sbr.rel (%p1511_p4) target bundleno = 20 (0x14), region = 60 }
   0xe   : > { %s1510_s12 = sshll.u32 %s2134_s11, 3  ;;  %vm324_vm0 = vcmask (!%p1511_p4), 261120   ;;  %v1841_v0 = vmov (!%p1511_p4), 0.0  }
   0xf   : > { %s1915_s15 = scalar_lea.vmem %s2123_s0, %s1510_s12  ;;  %325 = vst.msk [vmem:[#allocation2] sm:$0xff] (!%p1511_p4), %vm324_vm0, %v1841_v0  ;;  %326 = vst.msk [vmem:[#allocation3] sm:$0xff] (!%p1511_p4), %vm324_vm0, %v1841_v0 }
  0x10   : > { %327 = vst.msk [vmem:[#allocation4] sm:$0xff] (!%p1511_p4), %vm324_vm0, %v1841_v0  ;;  %328 = vst.msk [vmem:[#allocation5] sm:$0xff] (!%p1511_p4), %vm324_vm0, %v1841_v0 }
  0x14 PF: > { %v329_v1 = vld [vmem:[%s2124_s1] sm:$0xff]  ;;  %v330_v2 = vld [vmem:[%s2124_s1 + $0x8] sm:$0xff]  ;;  %vm346_vm1 = vcmask 130048   ;;  %v1842_v4 = vmov 0.0|0.0   ;;  %v333_v9 = vld [vmem:[%s2125_s2 + $0x10] sm:$0xff]  ;;  %vm1843_vm2 = vmmov 0  }
  0x15   : > { %v331_v3 = vld [vmem:[%s2125_s2] sm:$0xff]  ;;  %1721 = vmatprep.subr.bf16.mxu1 %v1842_v4  ;;  %v1717_v5 = vpack.c.bf16 %v330_v2, %v329_v1  ;;  %v332_v6 = vld [vmem:[%s2125_s2 + $0x8] sm:$0xff]  ;;  %v334_v10 = vld [vmem:[%s2125_s2 + $0x18] sm:$0xff]  ;;  %v1844_v11 = vmov 0.0   ;;  %vm451_vm3 = vcmask 261120   ;;  %s1845_s11 = smov 64  }
  0x16   : > { %v336_v7 = vld [vmem:[%s1915_s15] sm:$0xff]  ;;  %v1932_v8 = vpack.c.bf16 %v332_v6, %v331_v3  ;;  %1612 = vmatprep.mubr.msk.f32.mxu1 %vm1843_vm2, %v1844_v11  ;;  %v337_v12 = vld [vmem:[%s1915_s15 + $0x8] sm:$0xff]  ;;  %v1725_v13 = vpack.c.bf16 %v334_v10, %v333_v9  ;;  %s1846_s12 = smov 32   ;;  %v338_v32 = vld [vmem:[%s1915_s15 + $0x10] sm:$0xff]  ;;  %s1847_s14 = smov 96  }
  0x17   : > { %1598 = vmatprep.mubr.msk.f32.mxu0 %vm346_vm1, %v336_v7  ;;  %1718 = vmatprep.subr.bf16.mxu0 %v1717_v5  ;;  %v448_v14 = vld [vmem:[#allocation2] sm:$0xff]  ;;  %v449_v23 = vld [vmem:[#allocation3] sm:$0xff]  ;;  %v339_v33 = vld [vmem:[%s1915_s15 + $0x18] sm:$0xff]  ;;  %p1530_p5 = scmp.ne.s32.totalorder %s1907_s10, 1 }
  0x18   : > { %1723 = vmatpush3.bf16.msra.mxu1 %v1932_v8  ;;  %1720 = vmatpush3.bf16.msra.mxu0 %v1717_v5  ;;  %v1960_v15 = vld [vmem:[%s2126_s3] ss:$0 sm:$0xff]  ;;  %v865_v54 = vld [vmem:[%s2127_s4 + $0x8] sm:$0xff]  ;;  %v866_v58 = vld [vmem:[%s2127_s4 + $0x10] sm:$0xff]  ;;  %vm1849_vm4 = vmmov (!%p1530_p5), 0   ;;  %vm1475_vm5 = vcmask (!%p1530_p5), 80896  }
  0x19   : > { %1724 = vmatprep.subr.bf16.mxu1 %v1842_v4  ;;  %1727 = vmatprep.subr.bf16.mxu0 %v1842_v4  ;;  %v864_v53 = vld [vmem:[%s2127_s4] sm:$0xff]  ;;  %v867_v59 = vld [vmem:[%s2127_s4 + $0x18] sm:$0xff] }
  0x1a   : > { %v1745_v55 = vpack.c.bf16 %v865_v54, %v864_v53  ;;  %v1749_v60 = vpack.c.bf16 %v867_v59, %v866_v58 }
  0x1b   : > { %1599 = vmatmul.mubr.msk.f32.vlgmr.msra.gmra.mrb[0].mxu0 %vm346_vm1, %v337_v12 }
  0x1c   : > { %1726 = vmatpush3.bf16.msra.mxu1 %v1725_v13  ;;  %1729 = vmatpush3.bf16.msra.mxu0 %v1932_v8 }
  0x1d   : > { %1730 = vmatprep.subr.bf16.mxu0 %v1842_v4  ;;  %1733 = vmatprep.subr.bf16.mxu1 %v1842_v4 }
  0x1e   : > { %1601 = vmatprep.mubr.msk.f32.mxu0 %vm346_vm1, %v338_v32 }
  0x1f   : > { %1613 = vmatmul.mubr.msk.f32.vlgmr.msra.gmra.mrb[0].mxu1 %vm451_vm3, %v448_v14  ;;  %1602 = vmatmul.mubr.msk.f32.gmra.mrb[2].mxu0 %vm346_vm1, %v339_v33  ;;  %v2052_v33 = vld [vmem:[%s2129_s6] ss:$0 sm:$0xff] }
  0x20   : > { %1732 = vmatpush3.bf16.msra.mxu0 %v1725_v13  ;;  %1735 = vmatpush3.bf16.msra.mxu1 %v1932_v8 }
  0x21   : > { %1736 = vmatprep.subr.bf16.mxu1 %v1842_v4  ;;  %1634 = vmatprep.mubr.msk.f32.mxu1 %vm1843_vm2, %v1844_v11 }
  0x22   : > { %1739 = vmatprep.subr.bf16.mxu0 %v1842_v4  ;;  %1623 = vmatprep.mubr.msk.f32.mxu0 %vm1843_vm2, %v1844_v11 }
  0x24   : > { %1738 = vmatpush3.bf16.msra.mxu1 %v1725_v13 }
  0x25   : > { %1746 = vmatprep.subr.bf16.mxu1 %v1745_v55 }
  0xee   : > { %v1600_v16 = vpop.f32.mrb[0].mxu0 }
  0xef   : > { %v425_v17 = vpop.f32.mrb[1].mxu0  ;;  %v431_v40 = vadd.f32 %v1600_v16, %v1960_v15 }
  0xf0   : > { %v426_v18 = vadd.f32 %v1960_v15, %v425_v17 }
  0xf2   : > { %v521_v19 = vpop.f32.mrb[0].mxu1  ;;  %v1974_v37 = vpop.f32.mrb[2].mxu0 }
  0xf3   : > { %v525_v20 = vadd.f32 %v521_v19, %v426_v18  ;;  %v1614_v21 = vpop.f32.mrb[1].mxu1  ;;  %v435_v38 = vpop.f32.mrb[3].mxu0  ;;  %v868_v18 = vld [vmem:[%s2128_s5] sm:$0xff]  ;;  %v869_v19 = vld [vmem:[%s2128_s5 + $0x8] sm:$0xff] }
  0xf4   : > { %v436_v0 = vadd.f32 %v1960_v15, %v435_v38  ;;  %v870_v21 = vld [vmem:[%s2128_s5 + $0x10] sm:$0xff] }
  0xf5   : > { %1801 = vtanh.f32 %v525_v20  ;;  %v2017_v20 = vpack.c.bf16 %v869_v19, %v868_v18 }
  0xff   : > { %v1802_v22 = vpop.eup %1801 }
 0x100   : > { %535 = vrot.lane.b32.xlu0 %v1802_v22, %s1845_s11  ;;  %v527_v24 = vmul.f32 0.5, %v1802_v22  ;;  %v871_v22 = vld [vmem:[%s2128_s5 + $0x18] sm:$0xff] }
 0x102   : > { %v528_v25 = vadd.f32 0.5, %v527_v24 }
 0x104   : > { %530 = vrot.lane.b32.xlu0 %v449_v23, %s1846_s12  ;;  %v2027_v23 = vpack.c.bf16 %v871_v22, %v870_v21 }
 0x172   : > { %v536_v26 = vpop.permute.xlu0 %535 }
 0x173   : > { %v538_v27 = vmul.f32 %v536_v26, %v528_v25 }
 0x175   : > { %540 = vrot.lane.b32.xlu1 %v538_v27, %s1846_s12  ;;  %v984_v27 = vld [vmem:[#allocation4] sm:$0xff] }
 0x176   : > { %v531_v28 = vpop.permute.xlu0 %530 }
 0x177   : > { %v533_v29 = vmul.f32 %v531_v28, %v528_v25 }
 0x1e7   : > { %v541_v30 = vpop.permute.xlu1 %540 }
 0x1e8   : > { %v543_v31 = vadd.f32 %v541_v30, %v533_v29  ;;  %v441_v29 = vadd.f32 %v1974_v37, %v1960_v15  ;;  %v985_v15 = vld [vmem:[#allocation5] sm:$0xff] }
 0x1ea   : > { %1803 = vtanh.f32 %v543_v31 }
 0x1f4   : > { %v1804_v34 = vpop.eup %1803 }
 0x1f5   : > { %546 = vrot.lane.b32.xlu1 %v1804_v34, %s1845_s11 }
 0x267   : > { %v547_v35 = vpop.permute.xlu1 %546 }
 0x268   : > { %v549_v36 = vmul.f32 %v547_v35, %v528_v25 }
 0x26a   : > { %551 = vrot.lane.b32.xlu0 %v549_v36, %s1846_s12 }
 0x2dc   : > { %v552_v39 = vpop.permute.xlu0 %551 }
 0x2dd   : > { %554 = vst.msk [vmem:[#allocation7] sm:$0xff] %vm451_vm3, %v552_v39  ;;  %1624 = vmatmul.mubr.msk.f32.vlgmr.msra.gmra.mrb[4].mxu0 %vm451_vm3, %v552_v39 }
 0x2de   : > { %1741 = vmatpush3.bf16.msra.mxu0 %v1932_v8  ;;  %1645 = vmatprep.mubr.msk.f32.mxu0 %vm1843_vm2, %v1844_v11 }
 0x2df   : > { %1742 = vmatprep.subr.bf16.mxu0 %v1842_v4 }
 0x2e2   : > { %1744 = vmatpush3.bf16.msra.mxu0 %v1725_v13 }
 0x2e3   : > { %1753 = vmatprep.subr.bf16.mxu0 %v1842_v4 }
 0x2e4   : > { %v873_v62 = vld [vmem:[#allocation7] sm:$0xff] }
 0x3b0   : > { %v625_v41 = vpop.f32.mrb[4].mxu0 }
 0x3b1   : > { %v629_v42 = vadd.f32 %v625_v41, %v431_v40  ;;  %v1625_v43 = vpop.f32.mrb[5].mxu0 }
 0x3b3   : > { %1805 = vtanh.f32 %v629_v42 }
 0x3bd   : > { %v1806_v44 = vpop.eup %1805 }
 0x3be   : > { %635 = vrot.lane.b32.xlu1 %v1806_v44, %s1845_s11  ;;  %v631_v45 = vmul.f32 0.5, %v1806_v44 }
 0x3c0   : > { %v632_v46 = vadd.f32 0.5, %v631_v45 }
 0x3c2   : > { %v633_v49 = vmul.f32 %v632_v46, %v543_v31 }
 0x430   : > { %v636_v47 = vpop.permute.xlu1 %635 }
 0x431   : > { %v638_v48 = vmul.f32 %v636_v47, %v632_v46 }
 0x433   : > { %640 = vrot.lane.b32.xlu0 %v638_v48, %s1846_s12 }
 0x4a5   : > { %v641_v50 = vpop.permute.xlu0 %640 }
 0x4a6   : > { %v643_v51 = vadd.f32 %v641_v50, %v633_v49 }
 0x4a8   : > { %1807 = vtanh.f32 %v643_v51 }
 0x4b2   : > { %v1808_v52 = vpop.eup %1807 }
 0x4b3   : > { %646 = vrot.lane.b32.xlu1 %v1808_v52, %s1845_s11 }
 0x525   : > { %v647_v56 = vpop.permute.xlu1 %646 }
 0x526   : > { %v649_v57 = vmul.f32 %v647_v56, %v632_v46 }
 0x528   : > { %651 = vrot.lane.b32.xlu0 %v649_v57, %s1846_s12 }
 0x59a   : > { %v652_v61 = vpop.permute.xlu0 %651 }
 0x59b   : > { %655 = vst.msk [vmem:[#allocation7 + $0x8] sm:$0xff] %vm451_vm3, %v652_v61  ;;  %1635 = vmatmul.mubr.msk.f32.vlgmr.msra.gmra.mrb[2].mxu1 %vm451_vm3, %v652_v61 }
 0x59c   : > { %1748 = vmatpush3.bf16.msra.mxu1 %v1745_v55  ;;  %1656 = vmatprep.mubr.msk.f32.mxu1 %vm451_vm3, %v873_v62 }
 0x59d   : > { %1750 = vmatprep.subr.bf16.mxu1 %v1749_v60 }
 0x5a0   : > { %1752 = vmatpush3.bf16.msra.mxu1 %v1749_v60 }
 0x5a1   : > { %1759 = vmatprep.subr.bf16.mxu1 %v1842_v4 }
 0x5a2   : > { %v874_v63 = vld [vmem:[#allocation7 + $0x8] sm:$0xff] }
 0x5a3   : > { %1657 = vmatmul.mubr.msk.f32.vlgmr.msra.gmra.mrb[4].mxu1 %vm451_vm3, %v874_v63 }
 0x5a4   : > { %1761 = vmatpush3.bf16.msra.mxu1 %v2017_v20 }
 0x5a5   : > { %1762 = vmatprep.subr.bf16.mxu1 %v1842_v4 }
 0x5a8   : > { %1764 = vmatpush3.bf16.msra.mxu1 %v2027_v23 }
 0x5a9   : > { %1771 = vmatprep.subr.bf16.mxu1 %v1842_v4 }
 0x66e   : > { %v726_v1 = vpop.f32.mrb[2].mxu1 }
 0x66f   : > { %v730_v2 = vadd.f32 %v726_v1, %v436_v0  ;;  %v1636_v3 = vpop.f32.mrb[3].mxu1 }
 0x671   : > { %1809 = vtanh.f32 %v730_v2 }
 0x676   : > { %v2006_v5 = vpop.f32.mrb[4].mxu1 }
 0x677   : > { %v961_v6 = vpop.f32.mrb[5].mxu1  ;;  %v967_v2 = vadd.f32 %v2006_v5, %v2052_v33 }
 0x678   : > { %v962_v34 = vadd.f32 %v2052_v33, %v961_v6 }
 0x67b   : > { %v1810_v7 = vpop.eup %1809 }
 0x67c   : > { %736 = vrot.lane.b32.xlu1 %v1810_v7, %s1845_s11  ;;  %v732_v8 = vmul.f32 0.5, %v1810_v7 }
 0x67e   : > { %v733_v9 = vadd.f32 0.5, %v732_v8 }
 0x680   : > { %v734_v13 = vmul.f32 %v733_v9, %v643_v51 }
 0x6ee   : > { %v737_v10 = vpop.permute.xlu1 %736 }
 0x6ef   : > { %v739_v12 = vmul.f32 %v737_v10, %v733_v9 }
 0x6f1   : > { %741 = vrot.lane.b32.xlu0 %v739_v12, %s1846_s12 }
 0x763   : > { %v742_v14 = vpop.permute.xlu0 %741 }
 0x764   : > { %v744_v16 = vadd.f32 %v742_v14, %v734_v13 }
 0x766   : > { %1811 = vtanh.f32 %v744_v16 }
 0x770   : > { %v1812_v17 = vpop.eup %1811 }
 0x771   : > { %747 = vrot.lane.b32.xlu1 %v1812_v17, %s1845_s11 }
 0x7e3   : > { %v748_v24 = vpop.permute.xlu1 %747 }
 0x7e4   : > { %v750_v25 = vmul.f32 %v748_v24, %v733_v9 }
 0x7e6   : > { %752 = vrot.lane.b32.xlu0 %v750_v25, %s1846_s12 }
 0x858   : > { %v753_v26 = vpop.permute.xlu0 %752 }
 0x859   : > { %756 = vst.msk [vmem:[#allocation7 + $0x10] sm:$0xff] %vm451_vm3, %v753_v26  ;;  %1646 = vmatmul.mubr.msk.f32.vlgmr.msra.gmra.mrb[6].mxu0 %vm451_vm3, %v753_v26 }
 0x85a   : > { %1755 = vmatpush3.bf16.msra.mxu0 %v2017_v20  ;;  %1670 = vmatprep.mubr.msk.f32.mxu0 %vm1843_vm2, %v1844_v11 }
 0x85b   : > { %1756 = vmatprep.subr.bf16.mxu0 %v1842_v4 }
 0x85e   : > { %1758 = vmatpush3.bf16.msra.mxu0 %v2027_v23 }
 0x85f   : > { %1765 = vmatprep.subr.bf16.mxu0 %v1842_v4 }
 0x860   : > { %v875_v28 = vld [vmem:[#allocation7 + $0x10] sm:$0xff] }
 0x861   : > { %1671 = vmatmul.mubr.msk.f32.vlgmr.msra.gmra.mrb[8].mxu0 %vm451_vm3, %v984_v27  ;;  %1659 = vmatprep.mubr.msk.f32.mxu1 %vm451_vm3, %v875_v28 }
 0x862   : > { %1767 = vmatpush3.bf16.msra.mxu0 %v2017_v20  ;;  %1692 = vmatprep.mubr.msk.f32.mxu0 %vm1843_vm2, %v1844_v11 }
 0x863   : > { %1768 = vmatprep.subr.bf16.mxu0 %v1842_v4 }
 0x866   : > { %1770 = vmatpush3.bf16.msra.mxu0 %v2027_v23 }
 0x92c   : > { %v827_v30 = vpop.f32.mrb[6].mxu0 }
 0x92d   : > { %v831_v31 = vadd.f32 %v827_v30, %v441_v29  ;;  %v1647_v32 = vpop.f32.mrb[7].mxu0 }
 0x92f   : > { %1813 = vtanh.f32 %v831_v31 }
 0x934   : > { %v1056_v35 = vpop.f32.mrb[8].mxu0 }
 0x935   : > { %v1060_v36 = vadd.f32 %v1056_v35, %v962_v34  ;;  %v1672_v38 = vpop.f32.mrb[9].mxu0 }
 0x937   : > { %1815 = vtanh.f32 %v1060_v36 }
 0x939   : > { %v1814_v39 = vpop.eup %1813 }
 0x93a   : > { %837 = vrot.lane.b32.xlu1 %v1814_v39, %s1845_s11  ;;  %v833_v37 = vmul.f32 0.5, %v1814_v39 }
 0x93c   : > { %v834_v41 = vadd.f32 0.5, %v833_v37 }
 0x93e   : > { %v835_v48 = vmul.f32 %v834_v41, %v744_v16 }
 0x941   : > { %v1816_v40 = vpop.eup %1815 }
 0x942   : > { %1070 = vrot.lane.b32.xlu0 %v1816_v40, %s1845_s11  ;;  %v1062_v44 = vmul.f32 0.5, %v1816_v40 }
 0x944   : > { %v1063_v45 = vadd.f32 0.5, %v1062_v44 }
 0x946   : > { %1065 = vrot.lane.b32.xlu0 %v985_v15, %s1846_s12 }
 0x9ac   : > { %v838_v42 = vpop.permute.xlu1 %837 }
 0x9ad   : > { %v840_v43 = vmul.f32 %v838_v42, %v834_v41 }
 0x9af   : > { %842 = vrot.lane.b32.xlu1 %v840_v43, %s1846_s12 }
 0x9b4   : > { %v1071_v46 = vpop.permute.xlu0 %1070 }
 0x9b5   : > { %v1073_v47 = vmul.f32 %v1071_v46, %v1063_v45 }
 0x9b7   : > { %1075 = vrot.lane.b32.xlu1 %v1073_v47, %s1846_s12 }
 0x9b8   : > { %v1066_v51 = vpop.permute.xlu0 %1065 }
 0x9b9   : > { %v1068_v52 = vmul.f32 %v1066_v51, %v1063_v45 }
 0xa21   : > { %v843_v49 = vpop.permute.xlu1 %842 }
 0xa22   : > { %v2060_v50 = vadd.f32 %v843_v49, %v835_v48 }
 0xa24   : > { %1817 = vtanh.f32 %v2060_v50 }
 0xa29   : > { %v1076_v53 = vpop.permute.xlu1 %1075 }
 0xa2a   : > { %v1078_v54 = vadd.f32 %v1076_v53, %v1068_v52  ;;  %v1391_v53 = vld [vmem:[%s2130_s7 + $0x8] sm:$0xff] (!%p1530_p5) }
 0xa2c   : > { %1819 = vtanh.f32 %v1078_v54 }
 0xa2e   : > { %v1818_v55 = vpop.eup %1817 }
 0xa2f   : > { %848 = vrot.lane.b32.xlu0 %v1818_v55, %s1845_s11  ;;  %v1848_v55 = vmov (!%p1530_p5), 0.0|0.0  }
 0xa30   : > { %1777 = vmatprep.subr.bf16.mxu0 (!%p1530_p5), %v1848_v55 }
 0xa36   : > { %v1820_v56 = vpop.eup %1819 }
 0xa37   : > { %1081 = vrot.lane.b32.xlu1 %v1820_v56, %s1845_s11 }
 0xaa1   : > { %v849_v57 = vpop.permute.xlu0 %848 }
 0xaa2   : > { %v851_v58 = vmul.f32 %v849_v57, %v834_v41  ;;  %v1393_v57 = vld [vmem:[%s2130_s7 + $0x18] sm:$0xff] (!%p1530_p5) }
 0xaa4   : > { %853 = vrot.lane.b32.xlu0 %v851_v58, %s1846_s12  ;;  %v1850_v58 = vmov (!%p1530_p5), 0.0  }
 0xaa9   : > { %v1082_v59 = vpop.permute.xlu1 %1081 }
 0xaaa   : > { %v1084_v60 = vmul.f32 %v1082_v59, %v1063_v45 }
 0xaac   : > { %1087 = vrot.lane.b32.xlu1 %v1084_v60, %s1846_s12 }
 0xb16   : > { %v854_v61 = vpop.permute.xlu0 %853 }
 0xb17   : > { %857 = vst.msk [vmem:[#allocation7 + $0x18] sm:$0xff] %vm451_vm3, %v854_v61  ;;  %858 = vst.msk [vmem:[#allocation2] sm:$0xff] %vm451_vm3, %v854_v61  ;;  %v1531_v61 = vld [vmem:[%s2131_s8] ss:$0 sm:$0xff] (!%p1530_p5) }
 0xb1e   : > { %v876_v62 = vld [vmem:[#allocation7 + $0x18] sm:$0xff]  ;;  %v1088_v63 = vpop.permute.xlu1 %1087 }
 0xb1f   : > { %1660 = vmatmul.mubr.msk.f32.gmra.mrb[6].mxu1 %vm451_vm3, %v876_v62 }
 0xb20   : > { %1681 = vmatprep.mubr.msk.f32.mxu1 %vm1843_vm2, %v1844_v11 }
 0xb23   : > { %1682 = vmatmul.mubr.msk.f32.vlgmr.msra.gmra.mrb[8].mxu1 %vm451_vm3, %v1088_v63 }
 0xb24   : > { %1773 = vmatpush3.bf16.msra.mxu1 %v2017_v20  ;;  %1703 = vmatprep.mubr.msk.f32.mxu1 %vm1843_vm2, %v1844_v11 }
 0xb25   : > { %1774 = vmatprep.subr.bf16.mxu1 %v1842_v4 }
 0xb28   : > { %1776 = vmatpush3.bf16.msra.mxu1 %v2027_v23 }
 0xbf2   : > { %v1661_v0 = vpop.f32.mrb[6].mxu1 }
 0xbf3   : > { %v971_v1 = vpop.f32.mrb[7].mxu1  ;;  %v977_v36 = vadd.f32 %v1661_v0, %v2052_v33 }
 0xbf4   : > { %v972_v19 = vadd.f32 %v2052_v33, %v971_v1 }
 0xbf6   : > { %v1157_v3 = vpop.f32.mrb[8].mxu1 }
 0xbf7   : > { %v1161_v6 = vadd.f32 %v1157_v3, %v967_v2  ;;  %v1683_v7 = vpop.f32.mrb[9].mxu1 }
 0xbf9   : > { %1821 = vtanh.f32 %v1161_v6 }
 0xc03   : > { %v1822_v8 = vpop.eup %1821 }
 0xc04   : > { %1167 = vrot.lane.b32.xlu0 %v1822_v8, %s1845_s11  ;;  %v1163_v9 = vmul.f32 0.5, %v1822_v8 }
 0xc06   : > { %v1164_v10 = vadd.f32 0.5, %v1163_v9 }
 0xc08   : > { %v1165_v4 = vmul.f32 %v1164_v10, %v1078_v54  ;;  %v1392_v54 = vld [vmem:[%s2130_s7 + $0x10] sm:$0xff] (!%p1530_p5) }
 0xc09   : > { %v1781_v59 = vpack.c.bf16 (!%p1530_p5), %v1393_v57, %v1392_v54 }
 0xc76   : > { %v1168_v12 = vpop.permute.xlu0 %1167 }
 0xc77   : > { %v1170_v11 = vmul.f32 %v1168_v12, %v1164_v10 }
 0xc79   : > { %1172 = vrot.lane.b32.xlu1 %v1170_v11, %s1846_s12 }
 0xceb   : > { %v1173_v13 = vpop.permute.xlu1 %1172 }
 0xcec   : > { %v1175_v14 = vadd.f32 %v1173_v13, %v1165_v4 }
 0xcee   : > { %1823 = vtanh.f32 %v1175_v14 }
 0xcf8   : > { %v1824_v16 = vpop.eup %1823 }
 0xcf9   : > { %1178 = vrot.lane.b32.xlu0 %v1824_v16, %s1845_s11 }
 0xd6b   : > { %v1179_v5 = vpop.permute.xlu0 %1178 }
 0xd6c   : > { %v1181_v17 = vmul.f32 %v1179_v5, %v1164_v10 }
 0xd6e   : > { %1184 = vrot.lane.b32.xlu1 %v1181_v17, %s1846_s12 }
 0xde0   : > { %v1185_v18 = vpop.permute.xlu1 %1184 }
 0xde1   : > { %1693 = vmatmul.mubr.msk.f32.vlgmr.msra.gmra.mrb[10].mxu0 %vm451_vm3, %v1185_v18 }
 0xde2   : > { %1714 = vmatprep.mubr.msk.f32.mxu0 (!%p1530_p5), %vm1849_vm4, %v1850_v58 }
 0xeb4   : > { %v1254_v20 = vpop.f32.mrb[10].mxu0 }
 0xeb5   : > { %v1258_v21 = vadd.f32 %v1254_v20, %v972_v19  ;;  %v1694_v22 = vpop.f32.mrb[11].mxu0 }
 0xeb7   : > { %1825 = vtanh.f32 %v1258_v21 }
 0xec1   : > { %v1826_v23 = vpop.eup %1825 }
 0xec2   : > { %1264 = vrot.lane.b32.xlu0 %v1826_v23, %s1845_s11  ;;  %v1260_v24 = vmul.f32 0.5, %v1826_v23 }
 0xec4   : > { %v1261_v25 = vadd.f32 0.5, %v1260_v24 }
 0xec6   : > { %v1262_v28 = vmul.f32 %v1261_v25, %v1175_v14 }
 0xf34   : > { %v1265_v26 = vpop.permute.xlu0 %1264 }
 0xf35   : > { %v1267_v27 = vmul.f32 %v1265_v26, %v1261_v25 }
 0xf37   : > { %1269 = vrot.lane.b32.xlu1 %v1267_v27, %s1846_s12 }
 0xfa9   : > { %v1270_v29 = vpop.permute.xlu1 %1269 }
 0xfaa   : > { %v1272_v30 = vadd.f32 %v1270_v29, %v1262_v28 }
 0xfac   : > { %1827 = vtanh.f32 %v1272_v30 }
 0xfb6   : > { %v1828_v31 = vpop.eup %1827 }
 0xfb7   : > { %1275 = vrot.lane.b32.xlu0 %v1828_v31, %s1845_s11 }
0x1029   : > { %v1276_v32 = vpop.permute.xlu0 %1275 }
0x102a   : > { %v1278_v34 = vmul.f32 %v1276_v32, %v1261_v25 }
0x102c   : > { %1281 = vrot.lane.b32.xlu1 %v1278_v34, %s1846_s12 }
0x109e   : > { %v1282_v35 = vpop.permute.xlu1 %1281 }
0x109f   : > { %1704 = vmatmul.mubr.msk.f32.vlgmr.msra.gmra.mrb[10].mxu1 %vm451_vm3, %v1282_v35 }
0x1172   : > { %v1351_v38 = vpop.f32.mrb[10].mxu1 }
0x1173   : > { %v1355_v39 = vadd.f32 %v1351_v38, %v977_v36  ;;  %v1705_v40 = vpop.f32.mrb[11].mxu1 }
0x1175   : > { %1829 = vtanh.f32 %v1355_v39 }
0x117f   : > { %v1830_v15 = vpop.eup %1829 }
0x1180   : > { %1361 = vrot.lane.b32.xlu0 %v1830_v15, %s1845_s11  ;;  %v1357_v37 = vmul.f32 0.5, %v1830_v15 }
0x1182   : > { %v1358_v41 = vadd.f32 0.5, %v1357_v37 }
0x1184   : > { %v1359_v44 = vmul.f32 %v1358_v41, %v1272_v30 }
0x11f2   : > { %v1362_v42 = vpop.permute.xlu0 %1361 }
0x11f3   : > { %v1364_v43 = vmul.f32 %v1362_v42, %v1358_v41 }
0x11f5   : > { %1366 = vrot.lane.b32.xlu1 %v1364_v43, %s1846_s12 }
0x11f9   : > { %860 = vrot.lane.b32.xlu1 %v2060_v50, %s1847_s14  ;;  %v1390_v50 = vld [vmem:[%s2130_s7] sm:$0xff] (!%p1530_p5) }
0x11fa   : > { %v1778_v56 = vpack.c.bf16 (!%p1530_p5), %v1391_v53, %v1390_v50 }
0x11fc   : > { %1779 = vmatpush3.bf16.msra.mxu0 (!%p1530_p5), %v1778_v56 }
0x11fd   : > { %1780 = vmatprep.subr.bf16.mxu0 (!%p1530_p5), %v1848_v55 }
0x1200   : > { %1782 = vmatpush3.bf16.msra.mxu0 (!%p1530_p5), %v1781_v59 }
0x1267   : > { %v1367_v45 = vpop.permute.xlu1 %1366 }
0x1268   : > { %v1369_v46 = vadd.f32 %v1367_v45, %v1359_v44 }
0x126a   : > { %1831 = vtanh.f32 %v1369_v46  ;;  %1382 = vrot.lane.b32.xlu1 %v1369_v46, %s1847_s14 }
0x126b   : > { %v861_v33 = vpop.permute.xlu1 %860 }
0x126c   : > { %863 = vst.msk [vmem:[#allocation3] sm:$0xff] %vm451_vm3, %v861_v33 }
0x1274   : > { %v1832_v47 = vpop.eup %1831 }
0x1275   : > { %1372 = vrot.lane.b32.xlu0 %v1832_v47, %s1845_s11 }
0x12dc   : > { %v1383_v48 = vpop.permute.xlu1 %1382 }
0x12dd   : > { %1385 = vst.msk [vmem:[#allocation5] sm:$0xff] %vm451_vm3, %v1383_v48 }
0x12e7   : > { %v1373_v49 = vpop.permute.xlu0 %1372 }
0x12e8   : > { %v1375_v51 = vmul.f32 %v1373_v49, %v1358_v41 }
0x12ea   : > { %1377 = vrot.lane.b32.xlu0 %v1375_v51, %s1846_s12 }
0x1357   : > { %1389 = sbr.rel (%p1530_p5) target bundleno = 5180 (0x143c), region = 64 }
0x135c   : > { %v1378_v52 = vpop.permute.xlu0 %1377 }
0x135d   : > { %1380 = vst.msk [vmem:[#allocation4] sm:$0xff] %vm451_vm3, %v1378_v52 }
0x1364   : > { %v1395_v60 = vld [vmem:[#allocation4] sm:$0xff] }
0x1365   : > { %1715 = vmatmul.mubr.msk.f32.vlgmr.msra.gmra.mrb[0].mxu0 %vm451_vm3, %v1395_v60 }
0x1438   : > { %v1471_v62 = vpop.f32.mrb[0].mxu0 }
0x1439   : > { %v1472_v63 = vadd.f32 %v1531_v61, %v1471_v62  ;;  %v1716_v0 = vpop.f32.mrb[1].mxu0 }
0x143b   : > { %1476 = vst.msk [vmem:[%s2132_s9] sm:$0xff] %vm1475_vm5, %v1472_v63 }
0x143c PF: > { %s19_s30 = sadd.s32 1, %s1839_s30  }
0x143d   : > { %p16_p6 = scmp.ge.s32.totalorder %s19_s30, 4  }
0x143f   :  { %18 = sbr.rel (!%p16_p6) target bundleno = 1 (0x1), region = 96 }

</bundles_post_ra>
